<compile_context>
chip_gen: v6e
topology: v6e:2x2x1
jax: 0.10.0
libtpu: 0.0.40
codegen_flags: <defaults>
</compile_context>

<pallas_src>
import functools

import jax
import jax.numpy as jnp
from jax.experimental import pallas as pl
from jax.experimental.pallas import tpu as pltpu

LANE = 128


def _round_up(x, m):
    return ((x + m - 1) // m) * m


def _pad2(a, rows, cols):
    return jnp.pad(a, ((0, rows - a.shape[0]), (0, cols - a.shape[1])))


# ---------------------------------------------------------------------------
# Kernels
# ---------------------------------------------------------------------------
def gin_conv_kernel(a_ref, xs_ref, xd_ref, w_ref, b_ref, s_ref, t_ref,
                    o_ref, acc_ref, *, eps):
    """GINConv layer 1 (eval): o = bn1(relu(Linear_bnfolded((1+eps)*x + A@x)))."""
    k = pl.program_id(1)

    @pl.when(k == 0)
    def _init():
        acc_ref[...] = jnp.zeros_like(acc_ref)

    # Neighbor sum for this destination-row tile, accumulated over source tiles.
    acc_ref[...] += jnp.dot(a_ref[...].astype(jnp.float32), xs_ref[...],
                            preferred_element_type=jnp.float32)

    @pl.when(k == pl.num_programs(1) - 1)
    def _finalize():
        h = (1.0 + eps) * xd_ref[...] + acc_ref[...]
        # Linear; the MLP-internal BatchNorm is pre-folded into w/b on the host.
        h = jnp.dot(h, w_ref[...], preferred_element_type=jnp.float32) + b_ref[...]
        h = jnp.maximum(h, 0.0)                       # ReLU
        # post-ReLU BatchNorm (bn1); eval-mode dropout is the identity.
        o_ref[...] = (h * s_ref[...] + t_ref[...]).astype(o_ref.dtype)


def gin_conv_head_kernel(a_ref, xs_ref, xd_ref, w_ref, b_ref, wh_ref, bh_ref,
                         o_ref, acc_ref, *, eps):
    """GINConv layer 2 fused with bn2 (folded into the head) and the prediction head."""
    k = pl.program_id(1)

    @pl.when(k == 0)
    def _init():
        acc_ref[...] = jnp.zeros_like(acc_ref)

    acc_ref[...] += jnp.dot(a_ref[...].astype(jnp.float32), xs_ref[...],
                            preferred_element_type=jnp.float32)

    @pl.when(k == pl.num_programs(1) - 1)
    def _finalize():
        h = (1.0 + eps) * xd_ref[...] + acc_ref[...]
        h = jnp.dot(h, w_ref[...], preferred_element_type=jnp.float32) + b_ref[...]
        h = jnp.maximum(h, 0.0)                       # ReLU
        # bn2 + dropout(id) + linear_prediction; bn2 is pre-folded into wh/bh on the host.
        o_ref[...] = (jnp.dot(h, wh_ref[...], preferred_element_type=jnp.float32)
                      + bh_ref[...]).astype(o_ref.dtype)


# ---------------------------------------------------------------------------
# Wrapper
# ---------------------------------------------------------------------------
def _run_layer(kernel, a_pad, x_pad, small_args, d_out, tile):
    n_pad = a_pad.shape[0]
    d_in = x_pad.shape[1]
    grid = (n_pad // tile, n_pad // tile)

    def full_spec(arr):
        return pl.BlockSpec(arr.shape, lambda i, k: (0, 0))

    in_specs = [
        pl.BlockSpec((tile, tile), lambda i, k: (i, k)),   # A[dst tile, src tile]
        pl.BlockSpec((tile, d_in), lambda i, k: (k, 0)),   # features at source tile
        pl.BlockSpec((tile, d_in), lambda i, k: (i, 0)),   # features at destination tile
    ] + [full_spec(a) for a in small_args]

    return pl.pallas_call(
        kernel,
        out_shape=jax.ShapeDtypeStruct((n_pad, d_out), jnp.float32),
        grid_spec=pltpu.PrefetchScalarGridSpec(
            num_scalar_prefetch=0,
            grid=grid,
            in_specs=in_specs,
            out_specs=pl.BlockSpec((tile, d_out), lambda i, k: (i, 0)),
            scratch_shapes=[pltpu.VMEM((tile, d_in), jnp.float32)],
        ),
        compiler_params=pltpu.CompilerParams(
            dimension_semantics=("parallel", "arbitrary"),
            vmem_limit_bytes=48 * 1024 * 1024,
        ),
    )(a_pad, x_pad, x_pad, *small_args)


def _bn_fold(bn, eps=1e-5):
    gamma, beta, mean, var = bn
    scale = gamma / jnp.sqrt(var + eps)
    shift = beta - mean * scale
    return scale, shift


def gin_forward(x, adj, params, *, eps1=0.0, eps2=0.0, tile=512):
    """Eval-mode GIN forward.  `params` holds raw Linear + BatchNorm parameters."""
    n, d_in = x.shape
    d_hidden = params["w1"].shape[1]
    d_out = params["w3"].shape[1]

    # ---- host-side BatchNorm folding (eval statistics) ----
    s1a, t1a = _bn_fold(params["bn_mlp1"])    # BN inside conv1's MLP -> fold into w1/b1
    s1b, t1b = _bn_fold(params["bn1"])        # bn1 (post-ReLU)       -> stays in-kernel
    s2a, t2a = _bn_fold(params["bn_mlp2"])    # BN inside conv2's MLP -> fold into w2/b2
    s2b, t2b = _bn_fold(params["bn2"])        # bn2 (post-ReLU)       -> fold into head

    hp = jax.lax.Precision.HIGHEST
    w1f = params["w1"] * s1a[None, :]
    b1f = params["b1"] * s1a + t1a
    w2f = params["w2"] * s2a[None, :]
    b2f = params["b2"] * s2a + t2a
    w3f = s2b[:, None] * params["w3"]
    b3f = jnp.dot(t2b, params["w3"], precision=hp) + params["b3"]

    # ---- padding: lane-dense feature dims, node dim to a tile multiple ----
    d_in_p = _round_up(d_in, LANE)
    d_h_p = _round_up(d_hidden, LANE)
    d_out_p = _round_up(d_out, LANE)
    t = min(tile, _round_up(n, LANE))
    n_pad = _round_up(n, t)

    # bf16 adjacency is exact for small-integer edge multiplicities.
    a_pad = jnp.zeros((n_pad, n_pad), jnp.bfloat16).at[:n, :n].set(adj.astype(jnp.bfloat16))
    x_pad = jnp.zeros((n_pad, d_in_p), jnp.float32).at[:n, :d_in].set(x)

    w1p = _pad2(w1f, d_in_p, d_h_p)
    b1p = _pad2(b1f[None, :], 1, d_h_p)
    s1p = jnp.ones((1, d_h_p), jnp.float32).at[0, :d_hidden].set(s1b)
    t1p = jnp.zeros((1, d_h_p), jnp.float32).at[0, :d_hidden].set(t1b)
    w2p = _pad2(w2f, d_h_p, d_h_p)
    b2p = _pad2(b2f[None, :], 1, d_h_p)
    w3p = _pad2(w3f, d_h_p, d_out_p)
    b3p = _pad2(b3f[None, :], 1, d_out_p)

    conv1 = functools.partial(gin_conv_kernel, eps=float(eps1))
    conv2 = functools.partial(gin_conv_head_kernel, eps=float(eps2))

    h1 = _run_layer(conv1, a_pad, x_pad, (w1p, b1p, s1p, t1p), d_h_p, t)
    out = _run_layer(conv2, a_pad, h1, (w2p, b2p, w3p, b3p), d_out_p, t)
    return out[:n, :d_out]


# ---------------------------------------------------------------------------
# Pure-JAX reference (raw, unfolded params; f32 highest-precision matmuls)
# ---------------------------------------------------------------------------
def reference_forward(x, adj, params, eps1, eps2):
    hp = jax.lax.Precision.HIGHEST

    def bn(h, p):
        gamma, beta, mean, var = p
        return (h - mean) / jnp.sqrt(var + 1e-5) * gamma + beta

    h = (1.0 + eps1) * x + jnp.dot(adj, x, precision=hp)
    h = jnp.dot(h, params["w1"], precision=hp) + params["b1"]
    h = bn(h, params["bn_mlp1"])
    h = jnp.maximum(h, 0.0)
    h = bn(h, params["bn1"])                       # dropout(eval) = identity
    h = (1.0 + eps2) * h + jnp.dot(adj, h, precision=hp)
    h = jnp.dot(h, params["w2"], precision=hp) + params["b2"]
    h = bn(h, params["bn_mlp2"])
    h = jnp.maximum(h, 0.0)
    h = bn(h, params["bn2"])                       # dropout(eval) = identity
    return jnp.dot(h, params["w3"], precision=hp) + params["b3"]


if __name__ == "__main__":
    N, E = 200, 800                       # nodes, edges (small demo)
    input_dim, hidden_dim, output_dim = 8, 32, 4
    eps1, eps2 = 0.25, -0.125             # learned GINConv eps (static at inference)

    key = jax.random.PRNGKey(0)
    ks = jax.random.split(key, 25)

    # node features + random edge_index [2, E]
    x = jax.random.normal(ks[0], (N, input_dim), dtype=jnp.float32)
    src = jax.random.randint(ks[1], (E,), 0, N)
    dst = jax.random.randint(ks[2], (E,), 0, N)
    edge_index = jnp.stack([src, dst])    # shape [2, E] like PyG
    # dense adjacency: A[dst, src] += 1 (scatter-add -> multi-edges counted, like GINConv)
    adj = jnp.zeros((N, N), jnp.float32).at[edge_index[1], edge_index[0]].add(1.0)

    def linear(kw, kb, din, dout):
        bound = 1.0 / (din ** 0.5)
        w = jax.random.uniform(kw, (din, dout), jnp.float32, -bound, bound)
        b = jax.random.uniform(kb, (dout,), jnp.float32, -bound, bound)
        return w, b

    def bn_raw(kg, kb, km, kv, d):
        gamma = 1.0 + 0.1 * jax.random.normal(kg, (d,), jnp.float32)
        beta = 0.1 * jax.random.normal(kb, (d,), jnp.float32)
        mean = 0.1 * jax.random.normal(km, (d,), jnp.float32)
        var = jnp.abs(jax.random.normal(kv, (d,), jnp.float32)) + 0.5
        return gamma, beta, mean, var

    w1, b1 = linear(ks[3], ks[4], input_dim, hidden_dim)
    w2, b2 = linear(ks[5], ks[6], hidden_dim, hidden_dim)
    w3, b3 = linear(ks[7], ks[8], hidden_dim, output_dim)

    params = dict(
        w1=w1, b1=b1, w2=w2, b2=b2, w3=w3, b3=b3,
        bn_mlp1=bn_raw(ks[9], ks[10], ks[11], ks[12], hidden_dim),
        bn1=bn_raw(ks[13], ks[14], ks[15], ks[16], hidden_dim),
        bn_mlp2=bn_raw(ks[17], ks[18], ks[19], ks[20], hidden_dim),
        bn2=bn_raw(ks[21], ks[22], ks[23], ks[24], hidden_dim),
    )

    # tile=128 keeps the demo small while still exercising a (2, 2) grid with the
    # K-reduction accumulator; real graphs should use the default tile=512.
    out = gin_forward(x, adj, params, eps1=eps1, eps2=eps2, tile=128)
    out = jax.block_until_ready(out)

    ref = reference_forward(x, adj, params, eps1, eps2)
    assert out.shape == (N, output_dim)
    max_err = float(jnp.max(jnp.abs(out - ref)))
    assert jnp.allclose(out, ref, atol=1e-3, rtol=1e-3), f"max abs err {max_err}"
    print("KERNEL_OK")
</pallas_src>

<mosaic_0001>
module attributes {stable_mosaic.version = 11 : i64} {
  func.func @gin_conv_kernel(%arg0: i32, %arg1: i32, %arg2: memref<128x128xbf16, #tpu.memory_space<vmem>>, %arg3: memref<128x128xf32, #tpu.memory_space<vmem>>, %arg4: memref<128x128xf32, #tpu.memory_space<vmem>>, %arg5: memref<128x128xf32, #tpu.memory_space<vmem>>, %arg6: memref<1x128xf32, #tpu.memory_space<vmem>>, %arg7: memref<1x128xf32, #tpu.memory_space<vmem>>, %arg8: memref<1x128xf32, #tpu.memory_space<vmem>>, %arg9: memref<128x128xf32, #tpu.memory_space<vmem>>, %arg10: memref<128x128xf32, #tpu.memory_space<vmem>>) attributes {dimension_semantics = [#tpu.dimension_semantics<parallel>, #tpu.dimension_semantics<arbitrary>], iteration_bounds = array<i64: 2, 2>, scalar_prefetch = 0 : i64, scratch_operands = 1 : i64, tpu.core_type = #tpu.core_type<tc>, window_params = [{transform_indices = @transform_0, window_bounds = array<i64: 128, 128>}, {transform_indices = @transform_1, window_bounds = array<i64: 128, 128>}, {transform_indices = @transform_2, window_bounds = array<i64: 128, 128>}, {pipeline_mode = #tpu.pipeline_mode<synchronous>, transform_indices = @transform_3, window_bounds = array<i64: 128, 128>}, {pipeline_mode = #tpu.pipeline_mode<synchronous>, transform_indices = @transform_4, window_bounds = array<i64: 1, 128>}, {pipeline_mode = #tpu.pipeline_mode<synchronous>, transform_indices = @transform_5, window_bounds = array<i64: 1, 128>}, {pipeline_mode = #tpu.pipeline_mode<synchronous>, transform_indices = @transform_6, window_bounds = array<i64: 1, 128>}, {transform_indices = @transform_7, window_bounds = array<i64: 128, 128>}]} {
    %c0_i32 = arith.constant 0 : i32
    %0 = arith.cmpi eq, %arg1, %c0_i32 : i32
    %1 = arith.extui %0 : i1 to i32
    %c0_i32_0 = arith.constant 0 : i32
    %2 = arith.cmpi ne, %1, %c0_i32_0 : i32
    scf.if %2 {
      %cst_9 = arith.constant 0.000000e+00 : f32
      %13 = vector.broadcast %cst_9 : f32 to vector<128x128xf32>
      %c0_10 = arith.constant 0 : index
      %c0_11 = arith.constant 0 : index
      %14 = vector.load %arg10[%c0_10, %c0_11] : memref<128x128xf32, #tpu.memory_space<vmem>>, vector<128x128xf32>
      tpu.vector_store %arg10[%c0_10, %c0_11], %13 {strides = array<i32>} : memref<128x128xf32, #tpu.memory_space<vmem>>, vector<128x128xf32>,
    } else {
    }
    %c0 = arith.constant 0 : index
    %c0_1 = arith.constant 0 : index
    %3 = vector.load %arg10[%c0, %c0_1] : memref<128x128xf32, #tpu.memory_space<vmem>>, vector<128x128xf32>
    %c0_2 = arith.constant 0 : index
    %c0_3 = arith.constant 0 : index
    %4 = vector.load %arg2[%c0_2, %c0_3] : memref<128x128xbf16, #tpu.memory_space<vmem>>, vector<128x128xbf16>
    %5 = arith.extf %4 : vector<128x128xbf16> to vector<128x128xf32>
    %c0_4 = arith.constant 0 : index
    %c0_5 = arith.constant 0 : index
    %6 = vector.load %arg3[%c0_4, %c0_5] : memref<128x128xf32, #tpu.memory_space<vmem>>, vector<128x128xf32>
    %cst = arith.constant dense<0.000000e+00> : vector<128x128xf32>
    %7 = tpu.matmul %5, %6, %cst {dimension_numbers = #tpu.dot_dimension_numbers<[1], [0], [0], [1], [0, 0, 1, 1], [], []>} : vector<128x128xf32>, vector<128x128xf32>, vector<128x128xf32> -> vector<128x128xf32>
    %8 = arith.addf %3, %7 : vector<128x128xf32>
    %c0_6 = arith.constant 0 : index
    %c0_7 = arith.constant 0 : index
    %9 = vector.load %arg10[%c0_6, %c0_7] : memref<128x128xf32, #tpu.memory_space<vmem>>, vector<128x128xf32>
    tpu.vector_store %arg10[%c0_6, %c0_7], %8 {strides = array<i32>} : memref<128x128xf32, #tpu.memory_space<vmem>>, vector<128x128xf32>,
    %c1_i32 = arith.constant 1 : i32
    %10 = arith.cmpi eq, %arg1, %c1_i32 : i32
    %11 = arith.extui %10 : i1 to i32
    %c0_i32_8 = arith.constant 0 : i32
    %12 = arith.cmpi ne, %11, %c0_i32_8 : i32
    scf.if %12 {
      %c0_9 = arith.constant 0 : index
      %c0_10 = arith.constant 0 : index
      %13 = vector.load %arg4[%c0_9, %c0_10] : memref<128x128xf32, #tpu.memory_space<vmem>>, vector<128x128xf32>
      %cst_11 = arith.constant 1.250000e+00 : f32
      %14 = vector.broadcast %cst_11 : f32 to vector<128x128xf32>
      %15 = arith.mulf %14, %13 : vector<128x128xf32>
      %c0_12 = arith.constant 0 : index
      %c0_13 = arith.constant 0 : index
      %16 = vector.load %arg10[%c0_12, %c0_13] : memref<128x128xf32, #tpu.memory_space<vmem>>, vector<128x128xf32>
      %17 = arith.addf %15, %16 : vector<128x128xf32>
      %c0_14 = arith.constant 0 : index
      %c0_15 = arith.constant 0 : index
      %18 = vector.load %arg5[%c0_14, %c0_15] : memref<128x128xf32, #tpu.memory_space<vmem>>, vector<128x128xf32>
      %cst_16 = arith.constant dense<0.000000e+00> : vector<128x128xf32>
      %19 = tpu.matmul %17, %18, %cst_16 {dimension_numbers = #tpu.dot_dimension_numbers<[1], [0], [0], [1], [0, 0, 1, 1], [], []>} : vector<128x128xf32>, vector<128x128xf32>, vector<128x128xf32> -> vector<128x128xf32>
      %c0_17 = arith.constant 0 : index
      %c0_18 = arith.constant 0 : index
      %20 = vector.load %arg6[%c0_17, %c0_18] : memref<1x128xf32, #tpu.memory_space<vmem>>, vector<1x128xf32>
      %21 = vector.broadcast %20 : vector<1x128xf32> to vector<128x128xf32>
      %22 = arith.addf %19, %21 : vector<128x128xf32>
      %cst_19 = arith.constant 0.000000e+00 : f32
      %23 = vector.broadcast %cst_19 : f32 to vector<128x128xf32>
      %24 = arith.maximumf %22, %23 : vector<128x128xf32>
      %c0_20 = arith.constant 0 : index
      %c0_21 = arith.constant 0 : index
      %25 = vector.load %arg7[%c0_20, %c0_21] : memref<1x128xf32, #tpu.memory_space<vmem>>, vector<1x128xf32>
      %26 = vector.broadcast %25 : vector<1x128xf32> to vector<128x128xf32>
      %27 = arith.mulf %24, %26 : vector<128x128xf32>
      %c0_22 = arith.constant 0 : index
      %c0_23 = arith.constant 0 : index
      %28 = vector.load %arg8[%c0_22, %c0_23] : memref<1x128xf32, #tpu.memory_space<vmem>>, vector<1x128xf32>
      %29 = vector.broadcast %28 : vector<1x128xf32> to vector<128x128xf32>
      %30 = arith.addf %27, %29 : vector<128x128xf32>
      %c0_24 = arith.constant 0 : index
      %c0_25 = arith.constant 0 : index
      %31 = vector.load %arg9[%c0_24, %c0_25] : memref<128x128xf32, #tpu.memory_space<vmem>>, vector<128x128xf32>
      tpu.vector_store %arg9[%c0_24, %c0_25], %30 {strides = array<i32>} : memref<128x128xf32, #tpu.memory_space<vmem>>, vector<128x128xf32>,
    } else {
    }
    return
  }
  func.func @transform_0(%arg0: i32, %arg1: i32) -> (i32, i32) {
    %c0_i32 = arith.constant 0 : i32
    return %arg0, %arg1 : i32, i32
  }
  func.func @transform_1(%arg0: i32, %arg1: i32) -> (i32, i32) {
    %c0_i32 = arith.constant 0 : i32
    %c0_i32_0 = arith.constant 0 : i32
    return %arg1, %c0_i32 : i32, i32
  }
  func.func @transform_2(%arg0: i32, %arg1: i32) -> (i32, i32) {
    %c0_i32 = arith.constant 0 : i32
    %c0_i32_0 = arith.constant 0 : i32
    return %arg0, %c0_i32 : i32, i32
  }
  func.func @transform_3(%arg0: i32, %arg1: i32) -> (i32, i32) {
    %c0_i32 = arith.constant 0 : i32
    %c0_i32_0 = arith.constant 0 : i32
    %c0_i32_1 = arith.constant 0 : i32
    return %c0_i32, %c0_i32_0 : i32, i32
  }
  func.func @transform_4(%arg0: i32, %arg1: i32) -> (i32, i32) {
    %c0_i32 = arith.constant 0 : i32
    %c0_i32_0 = arith.constant 0 : i32
    %c0_i32_1 = arith.constant 0 : i32
    return %c0_i32, %c0_i32_0 : i32, i32
  }
  func.func @transform_5(%arg0: i32, %arg1: i32) -> (i32, i32) {
    %c0_i32 = arith.constant 0 : i32
    %c0_i32_0 = arith.constant 0 : i32
    %c0_i32_1 = arith.constant 0 : i32
    return %c0_i32, %c0_i32_0 : i32, i32
  }
  func.func @transform_6(%arg0: i32, %arg1: i32) -> (i32, i32) {
    %c0_i32 = arith.constant 0 : i32
    %c0_i32_0 = arith.constant 0 : i32
    %c0_i32_1 = arith.constant 0 : i32
    return %c0_i32, %c0_i32_0 : i32, i32
  }
  func.func @transform_7(%arg0: i32, %arg1: i32) -> (i32, i32) {
    %c0_i32 = arith.constant 0 : i32
    %c0_i32_0 = arith.constant 0 : i32
    return %arg0, %c0_i32 : i32, i32
  }
}

</mosaic_0001>

<bundles_post_ra>
// kernel: tpu_custom_call.1
= control target key start
LH: loop header
LB: loop body
LE: loop exit
PB: predicated region body
PF: predicated region fallthrough
CT: control target
= control target key end

     0   :  { %s2415_s0 = inlined_call_operand.hbm [shape: bf16[256,256], index: 0, kind: input, shape index: {}]   ;;  %s2416_s1 = inlined_call_operand.hbm [shape: f32[256,128], index: 1, kind: input, shape index: {}]   ;;  %s2417_s2 = inlined_call_operand.hbm [shape: f32[256,128], index: 2, kind: input, shape index: {}]   ;;  %s2418_s3 = inlined_call_operand.hbm [shape: f32[128,128], index: 3, kind: input, shape index: {}]   ;;  %s2419_s4 = inlined_call_operand.vmem [shape: f32[1,128], index: 4, kind: input, shape index: {}]   ;;  %s2420_s5 = inlined_call_operand.vmem [shape: f32[1,128], index: 5, kind: input, shape index: {}]   ;;  %s2421_s6 = inlined_call_operand.vmem [shape: f32[1,128], index: 6, kind: input, shape index: {}]   ;;  %s2422_s7 = inlined_call_operand.hbm [shape: f32[256,128], index: 7, kind: output, shape index: {}]  }
   0x1   :  { %2438 = sst [smem:[#allocation25_spill]] %s2415_s0 }
   0x2   :  { %2439 = sst [smem:[#allocation26_spill]] %s2416_s1 }
   0x3   :  { %2440 = sst [smem:[#allocation27_spill]] %s2418_s3 }
   0x4   :  { %2441 = sst [smem:[#allocation28_spill]] %s2419_s4 }
   0x5   :  { %2442 = sst [smem:[#allocation29_spill]] %s2420_s5 }
   0x6   :  { %2443 = sst [smem:[#allocation30_spill]] %s2421_s6 }
   0x7   :  { %2444 = sst [smem:[#allocation31_spill]] %s2422_s7 }
   0x8   :  { %12 = vsyncpa [#allocation4], 0 }
   0x9   :  { %14 = vsyncpa [#allocation4 + $0x1], 0 }
   0xa   :  { %15 = vsyncpa [#allocation7], 0 }
   0xb   :  { %17 = vsyncpa [#allocation7 + $0x1], 0 }
   0xc   :  { %18 = vsyncpa [#allocation10], 0 }
   0xd   :  { %19 = vsyncpa [#allocation5], 0 }
   0xe   :  { %21 = vsyncpa [#allocation5 + $0x1], 0  ;;  %s1925_s24 = smov 0   ;;  %s1927_s25 = smov 0  }
   0xf   :  { %s1929_s26 = smov 0   ;;  %s1931_s27 = smov 0  }
  0x10   :  { %s1933_s28 = smov 0   ;;  %s1935_s29 = smov 0  }
  0x11   :  { %s1937_s30 = smov 0   ;;  %s1939_s8 = smov 0  }
  0x12   :  { %s1941_s9 = smov 0   ;;  %s1943_s10 = smov 0  }
  0x13   :  { %s1945_s11 = smov 0   ;;  %s1947_s12 = smov 0  }
  0x14   :  { %s1949_s13 = smov 0   ;;  %s1951_s14 = smov 0  }
  0x15 LB: > { %2445 = sst [smem:[#allocation17_spill]] %s1839_s29  ;;  %s36_s15 = sadd.s32 1, %s1863_s12  ;;  %s1871_s14 = sphi %s1951_s14, %s27_s14   ;;  %s1867_s13 = sphi %s1949_s13, %s2494_s13   ;;  %s1863_s12 = sphi %s1947_s12, %s2504_s12   ;;  %s1859_s11 = sphi %s1945_s11, %s2492_s11   ;;  %s1855_s10 = sphi %s1943_s10, %s2503_s10   ;;  %s1851_s9 = sphi %s1941_s9, %s2502_s9   ;;  %s1847_s8 = sphi %s1939_s8, %s2501_s8   ;;  %s1843_s30 = sphi %s1937_s30, %s2500_s30   ;;  %s1839_s29 = sphi %s1935_s29, %s2491_s29   ;;  %s1835_s28 = sphi %s1933_s28, %s2499_s28   ;;  %s1831_s27 = sphi %s1931_s27, %s2498_s27   ;;  %s1827_s26 = sphi %s1929_s26, %s2497_s26   ;;  %s1823_s25 = sphi %s1927_s25, %s2496_s25   ;;  %s1819_s24 = sphi %s1925_s24, %s2495_s24  }
  0x16   : > { %2446 = sst [smem:[#allocation18_spill]] %s1855_s10  ;;  %s39_s16 = sadd.s32 1, %s1867_s13 }
  0x17   : > { %2447 = sst [smem:[#allocation19_spill]] %s1859_s11  ;;  %p37_p0 = scmp.ge.s32.totalorder %s36_s15, 2 }
  0x18   : > { %2448 = sst [smem:[#allocation20_spill]] %s1867_s13  ;;  %p2427_p1 = scmp.eq.s32.totalorder %s1871_s14, 0 }
  0x19   : > { %s74_s17 = sadd.s32 1, %s1839_s29  ;;  %p81_p2 = scmp.ne.s32.totalorder %s1839_s29, %s1835_s28 }
  0x1a   : > { %s2506_s15 = smov (%p37_p0, %s36_s15), 0  ;;  %s2508_s16 = smov (!%p37_p0, %s39_s16), %s1867_s13 }
  0x1b   : > { %2449 = sst [smem:[#allocation21_spill]] %s2506_s15  ;;  %s44_s18 = ssub.s32 %s1863_s12, %s2506_s15 }
  0x1c   : > { %p2008_p3 = por %p81_p2, %p2427_p1  ;;  %p41_p4 = scmp.ge.s32.totalorder %s2508_s16, 2 }
  0x1d   : > { %p72_p5 = scmp.eq.s32.totalorder %s44_s18, 0  ;;  %p87_p6 = scmp.ne.s32.totalorder %s1835_s28, %s1831_s27 }
  0x1e   : > { %s2510_s16 = smov (%p41_p4, %s2508_s16), 0  ;;  %p2426_p9 = scmp.lt.s32.totalorder %s1871_s14, 4 }
  0x1f   : > { %2451 = sst [smem:[#allocation22_spill]] %s2510_s16  ;;  %s2021_s21 = ssub.s32 %s1867_s13, %s2510_s16 }
  0x20   : > { %s2017_s20 = scalar_select %p72_p5, %s1839_s29, %s74_s17  }
  0x21   : > { %s45_s22 = sor.u32 %s44_s18, %s2021_s21  ;;  %s292_s15 = sand.u32 1, %s1871_s14  }
  0x22   : > { %2452 = sst [smem:[#allocation23_spill]] %s2017_s20  ;;  %p2025_p8 = scmp.eq.s32.totalorder %s45_s22, 0 }
  0x23   : > { %s294_s7 = sand.u32 1, %s1839_s29   ;;  %s1169_s6 = sshll.u32 %s1863_s12, 11 }
  0x24   : > { %s1146_s11 = sshll.u32 %s294_s7, 7  ;;  %s2454_s1 = sld [smem:[#allocation26_spill]] }
  0x25   : > { %s296_s20 = scalar_lea.vmem [#allocation6], %s1146_s11  ;;  %p2040_p10 = pnand %p2426_p9, %p2008_p3 }
  0x26   : > { %s303_s16 = sshll.u32 %s296_s20, 4  ;;  %s2044_s22 = scalar_lea.sflag [#allocation7], %s292_s15  ;;  %s304_s16 = int_to_ptr.vmem [resolvable:$true] %s303_s16 }
  0x27   : > { %p1607_p11 = pneg %p2040_p10  ;;  %s1618_s7 = scalar_lea.vmem %s304_s16, 2048 }
  0x28   : > { %p1619_p12 = scmp.ne.s32.totalorder %s304_s16, %s1618_s7  ;;  %s1873_s4 = smov [#allocation6]  }
  0x29   : > { %s1623_s5 = sshll.u32 %s1873_s4, 4  ;;  %s1624_s5 = int_to_ptr.vmem [resolvable:$false] %s1623_s5 }
  0x2a   : > { %s302_s17 = scalar_lea.hbm %s2454_s1, %s1169_s6  ;;  %p1621_p13 = pnand %p1619_p12, %p1607_p11 }
  0x2b   : > { %s1625_s6 = scalar_lea.vmem %s1624_s5, 4096  ;;  %p1626_p2 = scmp.lt.s32.totalorder %s304_s16, %s1624_s5 }
  0x2c   : > { %p1622_p0 = pneg %p1621_p13  ;;  %p1627_p4 = scmp.lt.s32.totalorder %s1625_s6, %s1618_s7 }
  0x2e   : > { %p1628_p3 = por %p1627_p4, %p1626_p2 }
  0x30   : > { %p1629_p5 = pnand %p1628_p3, %p1622_p0 }
  0x32   : > { %1632 = shalt.err (!%p1629_p5)
}
  0x33   : > { %s2433_s11 = smov 128   ;;  %s2432_s15 = smov 8  }
  0x34   : > { %1473 = dma.hbm_to_vmem [thread:$0]  (!%p2040_p10), %s302_s17, 2048, %s304_s16, %s2044_s22, %s2433_s11, %s2433_s11, %s2432_s15  }
  0x35   : > { %s2055_s19 = sadd.s32 4294967295, %s1871_s14   ;;  %p1139_p11 = scmp.ge.s32.totalorder %s1871_s14, 1 }
  0x36   : > { %p2436_p12 = scmp.eq.s32.totalorder %s2055_s19, 0  ;;  %p234_p0 = scmp.lt.s32.totalorder %s1871_s14, 5 }
  0x37   : > { %s1876_s16 = smov [#allocation9]   ;;  %s48_s7 = sadd.s32 1, %s1851_s9 }
  0x38   : > { %p2066_p2 = por %p87_p6, %p2436_p12  ;;  %p2070_p4 = pnand %p1139_p11, %p234_p0 }
  0x39   : > { %s246_s17 = sshll.u32 %s1876_s16, 4  ;;  %p55_p5 = scmp.ne.s32.totalorder %s1851_s9, %s1847_s8  ;;  %s247_s17 = int_to_ptr.vmem [resolvable:$true] %s246_s17 }
  0x3a   : > { %s2456_s20 = scalar_select %p2066_p2, 1, 0 }
  0x3b   : > { %p1463_p10 = pneg %p2070_p4  ;;  %s1644_s27 = scalar_lea.vmem %s247_s17, 2048 }
  0x3c   : > { %2457 = sst [smem:[#allocation24_spill]] %s2456_s20  ;;  %p1645_p6 = scmp.ne.s32.totalorder %s247_s17, %s1644_s27 }
  0x3d   : > { %p1464_p3 = pnand %p1463_p10, %p2436_p12  ;;  %p1652_p1 = scmp.lt.s32.totalorder %s247_s17, %s247_s17 }
  0x3e   : > { %p1653_p11 = scmp.lt.s32.totalorder %s1644_s27, %s1644_s27 }
  0x3f   : > { %p1635_p13 = pneg %p1464_p3 }
  0x40   : > { %p1654_p0 = por %p1653_p11, %p1652_p1 }
  0x41   : > { %p1647_p7 = pnand %p1645_p6, %p1635_p13 }
  0x43   : > { %p1648_p9 = pneg %p1647_p7 }
  0x45   : > { %p1655_p2 = pnand %p1654_p0, %p1648_p9 }
  0x47   : > { %1658 = shalt.err (!%p1655_p2)
}
  0x48   : > { %s2459_s3 = sld [smem:[#allocation27_spill]]  ;;  %p2460_p1 = scmp.eq.s32.totalorder %s1871_s14, 0 }
  0x49   : > { %s2090_s6 = scalar_select %p2025_p8, %s1851_s9, %s48_s7  }
  0x4a   : > { %p57_p7 = por %p2460_p1, %p55_p5  ;;  %p61_p9 = scmp.ne.s32.totalorder %s1847_s8, %s1843_s30 }
  0x4b   : > { %s269_s16 = sand.u32 1, %s1851_s9   ;;  %s1168_s27 = sshll.u32 %s1867_s13, 5 }
  0x4c   : > { %p2103_p13 = por %p2436_p12, %p61_p9  ;;  %s1142_s5 = sshll.u32 %s269_s16, 6 }
  0x4d   : > { %s279_s1 = sadd.s32 %s1863_s12, %s1168_s27  ;;  %s2462_s0 = sld [smem:[#allocation25_spill]] }
  0x4e   : > { %1466 = dma.hbm_to_vmem [thread:$0]  (!%p1464_p3), %s2459_s3, 2048, %s247_s17, [#allocation10], %s2433_s11, %s2433_s11, %s2432_s15  }
  0x4f   : > { %s1145_s29 = sshll.u32 %s279_s1, 6  ;;  %s273_s17 = scalar_lea.vmem [#allocation3], %s1142_s5 }
  0x50   : > { %s282_s7 = sshll.u32 %s273_s17, 4  ;;  %p2463_p8 = scmp.lt.s32.totalorder %s1871_s14, 4  ;;  %s283_s7 = int_to_ptr.vmem [resolvable:$true] %s282_s7 }
  0x51   : > { %s270_s15 = scalar_lea.sflag [#allocation4], %s269_s16  ;;  %s1672_s11 = scalar_lea.vmem %s283_s7, 1024 }
  0x52   : > { %p2113_p2 = pnand %p2463_p8, %p57_p7  ;;  %p1673_p3 = scmp.ne.s32.totalorder %s283_s7, %s1672_s11 }
  0x53   : > { %s281_s23 = scalar_lea.hbm %s2462_s0, %s1145_s29  ;;  %s1877_s1 = smov [#allocation3]  }
  0x54   : > { %p1661_p10 = pneg %p2113_p2  ;;  %s1677_s27 = sshll.u32 %s1877_s1, 4  ;;  %s1678_s27 = int_to_ptr.vmem [resolvable:$false] %s1677_s27 }
  0x55   : > { %s1679_s29 = scalar_lea.vmem %s1678_s27, 2048  ;;  %p1680_p11 = scmp.lt.s32.totalorder %s283_s7, %s1678_s27 }
  0x56   : > { %p1675_p5 = pnand %p1673_p3, %p1661_p10  ;;  %p1681_p0 = scmp.lt.s32.totalorder %s1679_s29, %s1672_s11 }
  0x58   : > { %p1676_p6 = pneg %p1675_p5  ;;  %p1682_p1 = por %p1681_p0, %p1680_p11 }
  0x5a   : > { %p1683_p9 = pnand %p1682_p1, %p1676_p6 }
  0x5c   : > { %1686 = shalt.err (!%p1683_p9)
}
  0x5d   : > { %s1878_s10 = smov 64   ;;  %s1879_s20 = smov 4  }
  0x5e   : > { %s2465_s11 = smov 128   ;;  %s1138_s16 = sadd.s32 4294967294, %s1871_s14  }
  0x5f   : > { %1470 = dma.hbm_to_vmem [thread:$0]  (!%p2113_p2), %s281_s23, 1024, %s283_s7, %s270_s15, %s2465_s11, %s1878_s10, %s1879_s20  }
  0x60   : > { %s100_s5 = sadd.s32 1, %s1827_s26  ;;  %p107_p7 = scmp.ne.s32.totalorder %s1827_s26, %s1823_s25 }
  0x61   : > { %p2466_p8 = scmp.eq.s32.totalorder %s2021_s21, 0  ;;  %p2467_p10 = scmp.eq.s32.totalorder %s1871_s14, 0 }
  0x62   : > { %p113_p5 = scmp.ne.s32.totalorder %s1823_s25, %s1819_s24  ;;  %p2469_p6 = scmp.eq.s32.totalorder %s2055_s19, 3 }
  0x63   : > { %s2129_s17 = scalar_select %p2466_p8, %s1827_s26, %s100_s5  }
  0x64   : > { %p2133_p3 = por %p107_p7, %p2467_p10  ;;  %p2141_p11 = por %p2469_p6, %p107_p7 }
  0x65   : > { %p227_p2 = scmp.eq.s32.totalorder %s1138_s16, 3  ;;  %p2147_p0 = por %p113_p5, %p2436_p12 }
  0x66   : > { %s2470_s27 = scalar_select %p2141_p11, 1, 0 }
  0x67   : > { %s315_s21 = sand.u32 1, %s1827_s26   ;;  %p2152_p1 = por %p227_p2, %p113_p5 }
  0x68   : > { %s1149_s7 = sshll.u32 %s315_s21, 7  ;;  %s1170_s30 = sshll.u32 %s1867_s13, 11 }
  0x69   : > { %s2472_s23 = scalar_select %p2152_p1, 1, 0 }
  0x6a   : > { %s323_s20 = scalar_lea.hbm %s2417_s2, %s1170_s30  ;;  %s317_s5 = scalar_lea.vmem [#allocation8], %s1149_s7 }
  0x6b   : > { %s324_s0 = sshll.u32 %s317_s5, 4  ;;  %p2473_p9 = scmp.lt.s32.totalorder %s1871_s14, 4  ;;  %s325_s0 = int_to_ptr.vmem [resolvable:$true] %s324_s0 }
  0x6c   : > { %s1700_s3 = scalar_lea.vmem %s325_s0, 2048  ;;  %s1880_s21 = smov [#allocation8]  }
  0x6d   : > { %p2164_p7 = pnand %p2473_p9, %p2133_p3  ;;  %p1701_p10 = scmp.ne.s32.totalorder %s325_s0, %s1700_s3 }
  0x6e   : > { %s1705_s13 = sshll.u32 %s1880_s21, 4  ;;  %s1706_s13 = int_to_ptr.vmem [resolvable:$false] %s1705_s13 }
  0x6f   : > { %p1689_p8 = pneg %p2164_p7  ;;  %s1707_s30 = scalar_lea.vmem %s1706_s13, 4096 }
  0x70   : > { %p1708_p2 = scmp.lt.s32.totalorder %s325_s0, %s1706_s13  ;;  %p1709_p12 = scmp.lt.s32.totalorder %s1707_s30, %s1700_s3 }
  0x71   : > { %p1703_p5 = pnand %p1701_p10, %p1689_p8 }
  0x72   : > { %p1710_p1 = por %p1709_p12, %p1708_p2 }
  0x73   : > { %p1704_p6 = pneg %p1703_p5 }
  0x75   : > { %p1711_p11 = pnand %p1710_p1, %p1704_p6 }
  0x77   : > { %1714 = shalt.err (!%p1711_p11)
}
  0x78   : > { %s2475_s1 = smov 8   ;;  %336 = sbr.rel (%p2070_p4) target bundleno = 687 (0x2af), region = 48 }
  0x79   : > { %1476 = dma.hbm_to_vmem [thread:$0]  (!%p2164_p7), %s323_s20, 2048, %s325_s0, %s2044_s22, %s2465_s11, %s2465_s11, %s2475_s1  }
  0x7a   : > { %s338_s7 = sand.u32 (!%p2070_p4), 1, %s1847_s8  }
  0x7b   : > { %s1153_s29 = sshll.u32 (!%p2070_p4), %s338_s7, 6  ;;  %s339_s10 = scalar_lea.sflag (!%p2070_p4), [#allocation4], %s338_s7 }
  0x7c   : > { %s2179_s13 = scalar_lea.vmem (!%p2070_p4), [#allocation3], %s1153_s29 }
  0x7d   : > { %1798 = dma.done.wait (%p2103_p13), %s339_s10, 1024  }
  0x7e   : > { %1800 = vsyncadd (%p2103_p13), %s339_s10, 4294966272  ;;  %s2476_s3 = sld [smem:[#allocation24_spill]]  ;;  %s347_s5 = sand.u32 1, %s2055_s19  }
  0x7f   : > { %s349_s0 = sand.u32 1, %s1835_s28   ;;  %s348_s18 = scalar_lea.sflag [#allocation7], %s347_s5 }
  0x80   : > { %s1154_s22 = sshll.u32 %s349_s0, 7 }
  0x81   : > { %s2187_s11 = scalar_lea.vmem [#allocation6], %s1154_s22 }
  0x84   : > { %p2477_p12 = scmp.ne.s32.totalorder %s2476_s3, 0 }
  0x86   : > { %1802 = dma.done.wait (%p2477_p12), %s348_s18, 2048  }
  0x87   : > { %1804 = vsyncadd (%p2477_p12), %s348_s18, 4294965248  ;;  %s358_s20 = sand.u32 1, %s1823_s25  }
  0x88   : > { %s1155_s4 = sshll.u32 %s358_s20, 7 }
  0x89   : > { %s2196_s16 = scalar_lea.vmem [#allocation8], %s1155_s4 }
  0x8a   : > { %1806 = dma.done.wait (%p2147_p0), %s348_s18, 2048  }
  0x8b   : > { %1808 = vsyncadd (%p2147_p0), %s348_s18, 4294965248  ;;  %p2478_p4 = scmp.eq.s32.totalorder %s2055_s19, 0 }
  0x8d   : > { %1810 = dma.done.wait (%p2478_p4), [#allocation10], 2048   ;;  %p2479_p13 = pmov %p2478_p4 }
  0x8e   : > { %s2206_s21 = scalar_lea.vmem [#allocation11], %s1155_s4  ;;  %s2480_s30 = sld [smem:[#allocation18_spill]] }
  0x8f   : > { %1812 = vsyncadd (%p2479_p13), [#allocation10], 4294965248 }
  0x94   : > { %p1158_p3 = scmp.ne.s32.totalorder %s2480_s30, 0 }
  0x96   : > { %412 = sbr.rel (%p1158_p3) target bundleno = 164 (0xa4), region = 68 }
  0x9b   : > { %v1881_v0 = vmov 0.0  }
  0x9c   : > { %413 = vst [vmem:[#allocation2 + $0x30] sm:$0xff] %v1881_v0  ;;  %414 = vst [vmem:[#allocation2] sm:$0xff] %v1881_v0 }
  0x9d   : > { %415 = vst [vmem:[#allocation2 + $0x58] sm:$0xff] %v1881_v0  ;;  %416 = vst [vmem:[#allocation2 + $0x18] sm:$0xff] %v1881_v0 }
  0x9e   : > { %417 = vst [vmem:[#allocation2 + $0x50] sm:$0xff] %v1881_v0  ;;  %418 = vst [vmem:[#allocation2 + $0x68] sm:$0xff] %v1881_v0 }
  0x9f   : > { %419 = vst [vmem:[#allocation2 + $0x8] sm:$0xff] %v1881_v0  ;;  %420 = vst [vmem:[#allocation2 + $0x48] sm:$0xff] %v1881_v0 }
  0xa0   : > { %421 = vst [vmem:[#allocation2 + $0x40] sm:$0xff] %v1881_v0  ;;  %422 = vst [vmem:[#allocation2 + $0x20] sm:$0xff] %v1881_v0 }
  0xa1   : > { %423 = vst [vmem:[#allocation2 + $0x10] sm:$0xff] %v1881_v0  ;;  %424 = vst [vmem:[#allocation2 + $0x38] sm:$0xff] %v1881_v0 }
  0xa2   : > { %425 = vst [vmem:[#allocation2 + $0x60] sm:$0xff] %v1881_v0  ;;  %426 = vst [vmem:[#allocation2 + $0x70] sm:$0xff] %v1881_v0 }
  0xa3   : > { %427 = vst [vmem:[#allocation2 + $0x78] sm:$0xff] %v1881_v0  ;;  %428 = vst [vmem:[#allocation2 + $0x28] sm:$0xff] %v1881_v0 }
  0xa4 PF: > { %v492_v1 = vld [vmem:[%s2187_s11 + $0x78] sm:$0xff]  ;;  %v491_v2 = vld [vmem:[%s2187_s11 + $0x70] sm:$0xff]  ;;  %v490_v3 = vld [vmem:[%s2187_s11 + $0x68] sm:$0xff]  ;;  %s2481_s19 = sld [smem:[#allocation18_spill]] }
  0xa5   : > { %1275 = vmatprep.subr.mxu0 %v492_v1  ;;  %1387 = vmatprep.subr.mxu1 %v492_v1  ;;  %v489_v4 = vld [vmem:[%s2187_s11 + $0x60] sm:$0xff]  ;;  %v488_v5 = vld [vmem:[%s2187_s11 + $0x58] sm:$0xff]  ;;  %v487_v6 = vld [vmem:[%s2187_s11 + $0x50] sm:$0xff] }
  0xa6   : > { %1276 = vmatpush3.msra.mxu0 %v492_v1  ;;  %1403 = vmatpush3.msra.mxu1 %v492_v1  ;;  %v486_v7 = vld [vmem:[%s2187_s11 + $0x48] sm:$0xff]  ;;  %v485_v8 = vld [vmem:[%s2187_s11 + $0x40] sm:$0xff]  ;;  %v484_v9 = vld [vmem:[%s2187_s11 + $0x38] sm:$0xff] }
  0xa7   : > { %1277 = vmatprep.subr.mxu0 %v491_v2  ;;  %1388 = vmatprep.subr.mxu1 %v491_v2  ;;  %v483_v10 = vld [vmem:[%s2187_s11 + $0x30] sm:$0xff]  ;;  %v482_v11 = vld [vmem:[%s2187_s11 + $0x28] sm:$0xff]  ;;  %v481_v12 = vld [vmem:[%s2187_s11 + $0x20] sm:$0xff] }
  0xa8   : > { %1278 = vmatpush3.msra.mxu0 %v491_v2  ;;  %1404 = vmatpush3.msra.mxu1 %v491_v2  ;;  %v480_v13 = vld [vmem:[%s2187_s11 + $0x18] sm:$0xff]  ;;  %v479_v14 = vld [vmem:[%s2187_s11 + $0x10] sm:$0xff]  ;;  %v478_v15 = vld [vmem:[%s2187_s11 + $0x8] sm:$0xff] }
  0xa9   : > { %1279 = vmatprep.subr.mxu0 %v490_v3  ;;  %1389 = vmatprep.subr.mxu1 %v490_v3  ;;  %v1173_v16 = vld [vmem:[%s2179_s13] sm:$0xff]   ;;  %v1204_v19 = vld [vmem:[%s2179_s13 + $0x8] sm:$0xff]   ;;  %v1205_v27 = vld [vmem:[%s2179_s13 + $0x10] sm:$0xff]  }
  0xaa   : > { %1280 = vmatpush3.msra.mxu0 %v490_v3  ;;  %1405 = vmatpush3.msra.mxu1 %v490_v3  ;;  %v1207_v17 = vld [vmem:[%s2179_s13 + $0x20] sm:$0xff]   ;;  %v1208_v20 = vld [vmem:[%s2179_s13 + $0x28] sm:$0xff]   ;;  %v1174_v21 = vunpack.c.l.bf16 %v1173_v16  ;;  %v1175_v23 = vunpack.c.h.bf16 %v1173_v16  ;;  %v1178_v25 = vunpack.c.l.bf16 %v1204_v19  ;;  %v1209_v28 = vld [vmem:[%s2179_s13 + $0x30] sm:$0xff]   ;;  %v1179_v29 = vunpack.c.h.bf16 %v1204_v19  ;;  %p1159_p11 = scmp.ne.s32.totalorder %s2481_s19, 1 }
  0xab   : > { %1281 = vmatprep.subr.mxu0 %v489_v4  ;;  %1390 = vmatprep.subr.mxu1 %v489_v4  ;;  %v477_v18 = vld [vmem:[%s2187_s11] sm:$0xff]  ;;  %v1190_v22 = vunpack.c.l.bf16 %v1207_v17  ;;  %v1191_v24 = vunpack.c.h.bf16 %v1207_v17  ;;  %v1194_v26 = vunpack.c.l.bf16 %v1208_v20  ;;  %v1195_v30 = vunpack.c.h.bf16 %v1208_v20  ;;  %v1206_v33 = vld [vmem:[%s2179_s13 + $0x18] sm:$0xff]   ;;  %v429_v45 = vld [vmem:[#allocation2 + $0x30] sm:$0xff]  ;;  %s2482_s7 = sld [smem:[#allocation28_spill]] (!%p1159_p11) }
  0xac   : > { %1282 = vmatpush3.msra.mxu0 %v489_v4  ;;  %1406 = vmatpush3.msra.mxu1 %v489_v4  ;;  %v1182_v31 = vunpack.c.l.bf16 %v1205_v27  ;;  %v1198_v32 = vunpack.c.l.bf16 %v1209_v28  ;;  %v1210_v34 = vld [vmem:[%s2179_s13 + $0x38] sm:$0xff]   ;;  %v1183_v35 = vunpack.c.h.bf16 %v1205_v27  ;;  %v1199_v36 = vunpack.c.h.bf16 %v1209_v28  ;;  %v430_v41 = vld [vmem:[#allocation2] sm:$0xff]  ;;  %v439_v58 = vld [vmem:[#allocation2 + $0x10] sm:$0xff]  ;;  %s2483_s13 = sld [smem:[#allocation29_spill]] (!%p1159_p11) }
  0xad   : > { %1283 = vmatprep.subr.mxu0 %v488_v5  ;;  %1391 = vmatprep.subr.mxu1 %v488_v5  ;;  %v1186_v37 = vunpack.c.l.bf16 %v1206_v33  ;;  %v1202_v38 = vunpack.c.l.bf16 %v1210_v34  ;;  %v1187_v39 = vunpack.c.h.bf16 %v1206_v33  ;;  %v1203_v40 = vunpack.c.h.bf16 %v1210_v34  ;;  %v438_v42 = vld [vmem:[#allocation2 + $0x20] sm:$0xff]  ;;  %v432_v51 = vld [vmem:[#allocation2 + $0x18] sm:$0xff]  ;;  %v434_v63 = vld [vmem:[#allocation2 + $0x68] sm:$0xff]  ;;  %s2484_s0 = sld [smem:[#allocation30_spill]] (!%p1159_p11) }
  0xae   : > { %1284 = vmatpush3.msra.mxu0 %v488_v5  ;;  %1407 = vmatpush3.msra.mxu1 %v488_v5  ;;  %v437_v46 = vld [vmem:[#allocation2 + $0x40] sm:$0xff]  ;;  %v440_v52 = vld [vmem:[#allocation2 + $0x38] sm:$0xff]  ;;  %v442_v0 = vld [vmem:[#allocation2 + $0x70] sm:$0xff] }
  0xaf   : > { %1285 = vmatprep.subr.mxu0 %v487_v6  ;;  %1392 = vmatprep.subr.mxu1 %v487_v6  ;;  %v431_v57 = vld [vmem:[#allocation2 + $0x58] sm:$0xff]  ;;  %v433_v5 = vld [vmem:[#allocation2 + $0x50] sm:$0xff]  ;;  %v435_v17 = vld [vmem:[#allocation2 + $0x8] sm:$0xff] }
  0xb0   : > { %1286 = vmatpush3.msra.mxu0 %v487_v6  ;;  %1408 = vmatpush3.msra.mxu1 %v487_v6  ;;  %v441_v6 = vld [vmem:[#allocation2 + $0x60] sm:$0xff] }
  0xb1   : > { %1287 = vmatprep.subr.mxu0 %v486_v7  ;;  %1393 = vmatprep.subr.mxu1 %v486_v7 }
  0xb2   : > { %1288 = vmatpush3.msra.mxu0 %v486_v7  ;;  %1409 = vmatpush3.msra.mxu1 %v486_v7 }
  0xb3   : > { %1289 = vmatprep.subr.mxu0 %v485_v8  ;;  %1394 = vmatprep.subr.mxu1 %v485_v8 }
  0xb4   : > { %1290 = vmatpush3.msra.mxu0 %v485_v8  ;;  %1410 = vmatpush3.msra.mxu1 %v485_v8 }
  0xb5   : > { %1291 = vmatprep.subr.mxu0 %v484_v9  ;;  %1395 = vmatprep.subr.mxu1 %v484_v9 }
  0xb6   : > { %1292 = vmatpush3.msra.mxu0 %v484_v9  ;;  %1411 = vmatpush3.msra.mxu1 %v484_v9 }
  0xb7   : > { %1293 = vmatprep.subr.mxu0 %v483_v10  ;;  %1396 = vmatprep.subr.mxu1 %v483_v10 }
  0xb8   : > { %1294 = vmatpush3.msra.mxu0 %v483_v10  ;;  %1412 = vmatpush3.msra.mxu1 %v483_v10 }
  0xb9   : > { %1295 = vmatprep.subr.mxu0 %v482_v11  ;;  %1397 = vmatprep.subr.mxu1 %v482_v11 }
  0xba   : > { %1296 = vmatpush3.msra.mxu0 %v482_v11  ;;  %1413 = vmatpush3.msra.mxu1 %v482_v11  ;;  %v436_v11 = vld [vmem:[#allocation2 + $0x48] sm:$0xff] }
  0xbb   : > { %1297 = vmatprep.subr.mxu0 %v481_v12  ;;  %1398 = vmatprep.subr.mxu1 %v481_v12 }
  0xbc   : > { %1298 = vmatpush3.msra.mxu0 %v481_v12  ;;  %1414 = vmatpush3.msra.mxu1 %v481_v12  ;;  %v444_v12 = vld [vmem:[#allocation2 + $0x28] sm:$0xff] }
  0xbd   : > { %1299 = vmatprep.subr.mxu0 %v480_v13  ;;  %1399 = vmatprep.subr.mxu1 %v480_v13 }
  0xbe   : > { %1300 = vmatpush3.msra.mxu0 %v480_v13  ;;  %1415 = vmatpush3.msra.mxu1 %v480_v13 }
  0xbf   : > { %1301 = vmatprep.subr.mxu0 %v479_v14  ;;  %1400 = vmatprep.subr.mxu1 %v479_v14 }
  0xc0   : > { %1302 = vmatpush3.msra.mxu0 %v479_v14  ;;  %1416 = vmatpush3.msra.mxu1 %v479_v14 }
  0xc1   : > { %1303 = vmatprep.subr.mxu0 %v478_v15  ;;  %1401 = vmatprep.subr.mxu1 %v478_v15 }
  0xc2   : > { %1304 = vmatpush3.msra.mxu0 %v478_v15  ;;  %1417 = vmatpush3.msra.mxu1 %v478_v15 }
  0xc3   : > { %1305 = vmatprep.subr.mxu0 %v477_v18  ;;  %1402 = vmatprep.subr.mxu1 %v477_v18 }
  0xc4   : > { %1306 = vmatpush3.msra.mxu0 %v477_v18  ;;  %1418 = vmatpush3.msra.mxu1 %v477_v18  ;;  %v443_v18 = vld [vmem:[#allocation2 + $0x78] sm:$0xff] }
  0xc5   : > { %1307 = vmatprep.mubr.f32.mxu0 %v1174_v21  ;;  %1319 = vmatprep.mubr.f32.mxu1 %v1190_v22 }
  0xc6   : > { %1308 = vmatmul.mubr.f32.vlgmr.msra.gmra.mxu0 %v1175_v23  ;;  %1320 = vmatmul.mubr.f32.vlgmr.msra.gmra.mxu1 %v1191_v24 }
  0xc7   : > { %1310 = vmatprep.mubr.f32.mxu0 %v1178_v25  ;;  %1322 = vmatprep.mubr.f32.mxu1 %v1194_v26 }
  0xca   : > { %1311 = vmatmul.mubr.f32.gmra.mxu0 %v1179_v29  ;;  %1323 = vmatmul.mubr.f32.gmra.mxu1 %v1195_v30 }
  0xcb   : > { %1313 = vmatprep.mubr.f32.mxu0 %v1182_v31  ;;  %1325 = vmatprep.mubr.f32.mxu1 %v1198_v32 }
  0xce   : > { %1314 = vmatmul.mubr.f32.gmra.mxu0 %v1183_v35  ;;  %1326 = vmatmul.mubr.f32.gmra.mxu1 %v1199_v36 }
  0xcf   : > { %1316 = vmatprep.mubr.f32.mxu0 %v1186_v37  ;;  %1328 = vmatprep.mubr.f32.mxu1 %v1202_v38 }
  0xd2   : > { %1317 = vmatmul.mubr.f32.gmra.mxu0 %v1187_v39  ;;  %1329 = vmatmul.mubr.f32.gmra.mxu1 %v1203_v40 }
 0x186   : > { %v1309_v43 = vpop.f32.mrf.mxu0  ;;  %v1321_v44 = vpop.f32.mrf.mxu1 }
 0x187   : > { %v639_v47 = vadd.f32 %v1309_v43, %v430_v41  ;;  %v647_v48 = vadd.f32 %v1321_v44, %v438_v42 }
 0x188   : > { %v559_v49 = vpop.f32.mrf.mxu0  ;;  %v599_v50 = vpop.f32.mrf.mxu1 }
 0x189   : > { %655 = vst [vmem:[#allocation2] sm:$0xff] %v639_v47  ;;  %663 = vst [vmem:[#allocation2 + $0x20] sm:$0xff] %v647_v48  ;;  %v638_v53 = vadd.f32 %v559_v49, %v429_v45  ;;  %v646_v54 = vadd.f32 %v599_v50, %v437_v46 }
 0x18a   : > { %v1312_v55 = vpop.f32.mrf.mxu0  ;;  %v1324_v56 = vpop.f32.mrf.mxu1 }
 0x18b   : > { %654 = vst [vmem:[#allocation2 + $0x30] sm:$0xff] %v638_v53  ;;  %662 = vst [vmem:[#allocation2 + $0x40] sm:$0xff] %v646_v54  ;;  %v641_v59 = vadd.f32 %v1312_v55, %v432_v51  ;;  %v649_v60 = vadd.f32 %v1324_v56, %v440_v52 }
 0x18c   : > { %v569_v61 = vpop.f32.mrf.mxu0  ;;  %v609_v62 = vpop.f32.mrf.mxu1 }
 0x18d   : > { %657 = vst [vmem:[#allocation2 + $0x18] sm:$0xff] %v641_v59  ;;  %665 = vst [vmem:[#allocation2 + $0x38] sm:$0xff] %v649_v60  ;;  %v640_v1 = vadd.f32 %v569_v61, %v431_v57  ;;  %v648_v2 = vadd.f32 %v609_v62, %v439_v58 }
 0x18e   : > { %v1315_v3 = vpop.f32.mrf.mxu0  ;;  %v1327_v4 = vpop.f32.mrf.mxu1 }
 0x18f   : > { %656 = vst [vmem:[#allocation2 + $0x58] sm:$0xff] %v640_v1  ;;  %664 = vst [vmem:[#allocation2 + $0x10] sm:$0xff] %v648_v2  ;;  %v643_v7 = vadd.f32 %v1315_v3, %v434_v63  ;;  %v651_v8 = vadd.f32 %v1327_v4, %v442_v0 }
 0x190   : > { %v579_v9 = vpop.f32.mrf.mxu0  ;;  %v619_v10 = vpop.f32.mrf.mxu1 }
 0x191   : > { %659 = vst [vmem:[#allocation2 + $0x68] sm:$0xff] %v643_v7  ;;  %667 = vst [vmem:[#allocation2 + $0x70] sm:$0xff] %v651_v8  ;;  %v642_v13 = vadd.f32 %v579_v9, %v433_v5  ;;  %v650_v14 = vadd.f32 %v619_v10, %v441_v6 }
 0x192   : > { %v1318_v15 = vpop.f32.mrf.mxu0  ;;  %v1330_v16 = vpop.f32.mrf.mxu1 }
 0x193   : > { %658 = vst [vmem:[#allocation2 + $0x50] sm:$0xff] %v642_v13  ;;  %666 = vst [vmem:[#allocation2 + $0x60] sm:$0xff] %v650_v14  ;;  %v645_v19 = vadd.f32 %v1318_v15, %v436_v11  ;;  %v653_v20 = vadd.f32 %v1330_v16, %v444_v12  ;;  %673 = sbr.rel (%p1159_p11) target bundleno = 660 (0x294), region = 72 }
 0x194   : > { %v589_v21 = vpop.f32.mrf.mxu0  ;;  %v629_v22 = vpop.f32.mrf.mxu1 }
 0x195   : > { %661 = vst [vmem:[#allocation2 + $0x48] sm:$0xff] %v645_v19  ;;  %669 = vst [vmem:[#allocation2 + $0x28] sm:$0xff] %v653_v20  ;;  %v644_v23 = vadd.f32 %v589_v21, %v435_v17  ;;  %v652_v24 = vadd.f32 %v629_v22, %v443_v18 }
 0x197   : > { %660 = vst [vmem:[#allocation2 + $0x8] sm:$0xff] %v644_v23  ;;  %668 = vst [vmem:[#allocation2 + $0x78] sm:$0xff] %v652_v24 }
 0x198   : > { %v753_v25 = vld [vmem:[#allocation9 + $0x78] sm:$0xff]  ;;  %v752_v26 = vld [vmem:[#allocation9 + $0x70] sm:$0xff]  ;;  %v751_v27 = vld [vmem:[#allocation9 + $0x68] sm:$0xff] }
 0x199   : > { %1331 = vmatprep.subr.mxu0 %v753_v25  ;;  %1419 = vmatprep.subr.mxu1 %v753_v25  ;;  %v750_v28 = vld [vmem:[#allocation9 + $0x60] sm:$0xff]  ;;  %v749_v29 = vld [vmem:[#allocation9 + $0x58] sm:$0xff]  ;;  %v748_v30 = vld [vmem:[#allocation9 + $0x50] sm:$0xff] }
 0x19a   : > { %1332 = vmatpush3.msra.mxu0 %v753_v25  ;;  %1435 = vmatpush3.msra.mxu1 %v753_v25  ;;  %v747_v31 = vld [vmem:[#allocation9 + $0x48] sm:$0xff]  ;;  %v746_v32 = vld [vmem:[#allocation9 + $0x40] sm:$0xff]  ;;  %v745_v33 = vld [vmem:[#allocation9 + $0x38] sm:$0xff] }
 0x19b   : > { %1333 = vmatprep.subr.mxu0 %v752_v26  ;;  %1420 = vmatprep.subr.mxu1 %v752_v26  ;;  %v744_v34 = vld [vmem:[#allocation9 + $0x30] sm:$0xff]  ;;  %v743_v35 = vld [vmem:[#allocation9 + $0x28] sm:$0xff]  ;;  %v742_v36 = vld [vmem:[#allocation9 + $0x20] sm:$0xff] }
 0x19c   : > { %1334 = vmatpush3.msra.mxu0 %v752_v26  ;;  %1436 = vmatpush3.msra.mxu1 %v752_v26  ;;  %v741_v37 = vld [vmem:[#allocation9 + $0x18] sm:$0xff]  ;;  %v674_v38 = vld [vmem:[%s2196_s16] sm:$0xff]  ;;  %v675_v40 = vld [vmem:[%s2196_s16 + $0x8] sm:$0xff] }
 0x19d   : > { %1335 = vmatprep.subr.mxu0 %v751_v27  ;;  %1421 = vmatprep.subr.mxu1 %v751_v27  ;;  %v682_v39 = vld [vmem:[%s2196_s16 + $0x40] sm:$0xff]  ;;  %v683_v41 = vld [vmem:[%s2196_s16 + $0x48] sm:$0xff]  ;;  %v740_v42 = vld [vmem:[#allocation9 + $0x10] sm:$0xff]  ;;  %v690_v46 = vmul.f32 1.25, %v674_v38  ;;  %v691_v51 = vmul.f32 1.25, %v675_v40 }
 0x19e   : > { %1336 = vmatpush3.msra.mxu0 %v751_v27  ;;  %1437 = vmatpush3.msra.mxu1 %v751_v27  ;;  %v676_v43 = vld [vmem:[%s2196_s16 + $0x10] sm:$0xff]  ;;  %v739_v45 = vld [vmem:[#allocation9 + $0x8] sm:$0xff]  ;;  %v698_v48 = vmul.f32 1.25, %v682_v39  ;;  %v738_v49 = vld [vmem:[#allocation9] sm:$0xff]  ;;  %v699_v53 = vmul.f32 1.25, %v683_v41 }
 0x19f   : > { %1337 = vmatprep.subr.mxu0 %v750_v28  ;;  %1422 = vmatprep.subr.mxu1 %v750_v28  ;;  %v684_v44 = vld [vmem:[%s2196_s16 + $0x50] sm:$0xff]  ;;  %v714_v50 = vld [vmem:[#allocation2 + $0x40] sm:$0xff]  ;;  %v692_v55 = vmul.f32 1.25, %v676_v43  ;;  %v708_v56 = vld [vmem:[#allocation2 + $0x58] sm:$0xff] }
 0x1a0   : > { %1338 = vmatpush3.msra.mxu0 %v750_v28  ;;  %1438 = vmatpush3.msra.mxu1 %v750_v28  ;;  %v706_v47 = vld [vmem:[#allocation2 + $0x30] sm:$0xff]  ;;  %v707_v52 = vld [vmem:[#allocation2] sm:$0xff]  ;;  %v700_v57 = vmul.f32 1.25, %v684_v44  ;;  %v677_v58 = vld [vmem:[%s2196_s16 + $0x18] sm:$0xff]  ;;  %v730_v0 = vadd.f32 %v714_v50, %v698_v48 }
 0x1a1   : > { %1339 = vmatprep.subr.mxu0 %v749_v29  ;;  %1423 = vmatprep.subr.mxu1 %v749_v29  ;;  %v715_v54 = vld [vmem:[#allocation2 + $0x20] sm:$0xff]  ;;  %v685_v59 = vld [vmem:[%s2196_s16 + $0x58] sm:$0xff]  ;;  %v716_v60 = vld [vmem:[#allocation2 + $0x10] sm:$0xff]  ;;  %v722_v63 = vadd.f32 %v706_v47, %v690_v46  ;;  %v723_v1 = vadd.f32 %v707_v52, %v691_v51  ;;  %v693_v3 = vmul.f32 1.25, %v677_v58  ;;  %v724_v7 = vadd.f32 %v708_v56, %v692_v55 }
 0x1a2   : > { %1340 = vmatpush3.msra.mxu0 %v749_v29  ;;  %1439 = vmatpush3.msra.mxu1 %v749_v29  ;;  %v678_v61 = vld [vmem:[%s2196_s16 + $0x20] sm:$0xff]  ;;  %v731_v2 = vadd.f32 %v715_v54, %v699_v53  ;;  %v709_v4 = vld [vmem:[#allocation2 + $0x18] sm:$0xff]  ;;  %v701_v5 = vmul.f32 1.25, %v685_v59  ;;  %v732_v8 = vadd.f32 %v716_v60, %v700_v57  ;;  %v710_v10 = vld [vmem:[#allocation2 + $0x50] sm:$0xff] }
 0x1a3   : > { %1341 = vmatprep.subr.mxu0 %v748_v30  ;;  %1424 = vmatprep.subr.mxu1 %v748_v30  ;;  %v686_v62 = vld [vmem:[%s2196_s16 + $0x60] sm:$0xff]  ;;  %v717_v6 = vld [vmem:[#allocation2 + $0x38] sm:$0xff]  ;;  %v694_v9 = vmul.f32 1.25, %v678_v61  ;;  %v679_v12 = vld [vmem:[%s2196_s16 + $0x28] sm:$0xff]  ;;  %v725_v17 = vadd.f32 %v709_v4, %v693_v3 }
 0x1a4   : > { %1342 = vmatpush3.msra.mxu0 %v748_v30  ;;  %1440 = vmatpush3.msra.mxu1 %v748_v30  ;;  %v702_v11 = vmul.f32 1.25, %v686_v62  ;;  %v687_v13 = vld [vmem:[%s2196_s16 + $0x68] sm:$0xff]  ;;  %v718_v14 = vld [vmem:[#allocation2 + $0x60] sm:$0xff]  ;;  %v680_v15 = vld [vmem:[%s2196_s16 + $0x30] sm:$0xff]  ;;  %v733_v18 = vadd.f32 %v717_v6, %v701_v5  ;;  %v695_v19 = vmul.f32 1.25, %v679_v12 }
 0x1a5   : > { %1343 = vmatprep.subr.mxu0 %v747_v31  ;;  %1425 = vmatprep.subr.mxu1 %v747_v31  ;;  %v688_v16 = vld [vmem:[%s2196_s16 + $0x70] sm:$0xff]  ;;  %v711_v20 = vld [vmem:[#allocation2 + $0x68] sm:$0xff]  ;;  %v703_v21 = vmul.f32 1.25, %v687_v13  ;;  %v726_v22 = vadd.f32 %v710_v10, %v694_v9  ;;  %v696_v25 = vmul.f32 1.25, %v680_v15  ;;  %v681_v27 = vld [vmem:[%s2196_s16 + $0x38] sm:$0xff] }
 0x1a6   : > { %1344 = vmatpush3.msra.mxu0 %v747_v31  ;;  %1441 = vmatpush3.msra.mxu1 %v747_v31  ;;  %v734_v23 = vadd.f32 %v718_v14, %v702_v11  ;;  %v719_v24 = vld [vmem:[#allocation2 + $0x70] sm:$0xff]  ;;  %v704_v26 = vmul.f32 1.25, %v688_v16  ;;  %v689_v28 = vld [vmem:[%s2196_s16 + $0x78] sm:$0xff]  ;;  %v712_v29 = vld [vmem:[#allocation2 + $0x8] sm:$0xff]  ;;  %v727_v31 = vadd.f32 %v711_v20, %v695_v19 }
 0x1a7   : > { %1345 = vmatprep.subr.mxu0 %v746_v32  ;;  %1426 = vmatprep.subr.mxu1 %v746_v32  ;;  %v720_v30 = vld [vmem:[#allocation2 + $0x78] sm:$0xff]  ;;  %v721_v38 = vld [vmem:[#allocation2 + $0x28] sm:$0xff]  ;;  %v2253_v41 = vld [vmem:[%s2482_s7] ss:$0 sm:$0xff] }
 0x1a8   : > { %1346 = vmatpush3.msra.mxu0 %v746_v32  ;;  %1442 = vmatpush3.msra.mxu1 %v746_v32  ;;  %v735_v32 = vadd.f32 %v719_v24, %v703_v21  ;;  %v2260_v46 = vld [vmem:[%s2483_s13] ss:$0 sm:$0xff] }
 0x1a9   : > { %1347 = vmatprep.subr.mxu0 %v745_v33  ;;  %1427 = vmatprep.subr.mxu1 %v745_v33  ;;  %v2267_v53 = vld [vmem:[%s2484_s0] ss:$0 sm:$0xff] }
 0x1aa   : > { %1348 = vmatpush3.msra.mxu0 %v745_v33  ;;  %1443 = vmatpush3.msra.mxu1 %v745_v33  ;;  %v697_v33 = vmul.f32 1.25, %v681_v27 }
 0x1ab   : > { %1349 = vmatprep.subr.mxu0 %v744_v34  ;;  %1428 = vmatprep.subr.mxu1 %v744_v34 }
 0x1ac   : > { %1350 = vmatpush3.msra.mxu0 %v744_v34  ;;  %1444 = vmatpush3.msra.mxu1 %v744_v34  ;;  %v705_v34 = vmul.f32 1.25, %v689_v28 }
 0x1ad   : > { %1351 = vmatprep.subr.mxu0 %v743_v35  ;;  %1429 = vmatprep.subr.mxu1 %v743_v35 }
 0x1ae   : > { %1352 = vmatpush3.msra.mxu0 %v743_v35  ;;  %1445 = vmatpush3.msra.mxu1 %v743_v35  ;;  %v728_v35 = vadd.f32 %v712_v29, %v696_v25  ;;  %v737_v40 = vadd.f32 %v721_v38, %v705_v34 }
 0x1af   : > { %1353 = vmatprep.subr.mxu0 %v742_v36  ;;  %1430 = vmatprep.subr.mxu1 %v742_v36 }
 0x1b0   : > { %1354 = vmatpush3.msra.mxu0 %v742_v36  ;;  %1446 = vmatpush3.msra.mxu1 %v742_v36  ;;  %v736_v36 = vadd.f32 %v720_v30, %v704_v26 }
 0x1b1   : > { %1355 = vmatprep.subr.mxu0 %v741_v37  ;;  %1431 = vmatprep.subr.mxu1 %v741_v37 }
 0x1b2   : > { %1356 = vmatpush3.msra.mxu0 %v741_v37  ;;  %1447 = vmatpush3.msra.mxu1 %v741_v37  ;;  %v713_v37 = vld [vmem:[#allocation2 + $0x48] sm:$0xff] }
 0x1b3   : > { %1357 = vmatprep.subr.mxu0 %v740_v42  ;;  %1432 = vmatprep.subr.mxu1 %v740_v42  ;;  %v729_v39 = vadd.f32 %v713_v37, %v697_v33 }
 0x1b4   : > { %1358 = vmatpush3.msra.mxu0 %v740_v42  ;;  %1448 = vmatpush3.msra.mxu1 %v740_v42 }
 0x1b5   : > { %1359 = vmatprep.subr.mxu0 %v739_v45  ;;  %1433 = vmatprep.subr.mxu1 %v739_v45 }
 0x1b6   : > { %1360 = vmatpush3.msra.mxu0 %v739_v45  ;;  %1449 = vmatpush3.msra.mxu1 %v739_v45 }
 0x1b7   : > { %1361 = vmatprep.subr.mxu0 %v738_v49  ;;  %1434 = vmatprep.subr.mxu1 %v738_v49 }
 0x1b8   : > { %1362 = vmatpush3.msra.mxu0 %v738_v49  ;;  %1450 = vmatpush3.msra.mxu1 %v738_v49 }
 0x1b9   : > { %1363 = vmatprep.mubr.f32.mxu0 %v722_v63  ;;  %1375 = vmatprep.mubr.f32.mxu1 %v730_v0 }
 0x1ba   : > { %1364 = vmatmul.mubr.f32.vlgmr.msra.gmra.mxu0 %v723_v1  ;;  %1376 = vmatmul.mubr.f32.vlgmr.msra.gmra.mxu1 %v731_v2 }
 0x1bb   : > { %1366 = vmatprep.mubr.f32.mxu0 %v724_v7  ;;  %1378 = vmatprep.mubr.f32.mxu1 %v732_v8 }
 0x1be   : > { %1367 = vmatmul.mubr.f32.gmra.mxu0 %v725_v17  ;;  %1379 = vmatmul.mubr.f32.gmra.mxu1 %v733_v18 }
 0x1bf   : > { %1369 = vmatprep.mubr.f32.mxu0 %v726_v22  ;;  %1381 = vmatprep.mubr.f32.mxu1 %v734_v23 }
 0x1c2   : > { %1370 = vmatmul.mubr.f32.gmra.mxu0 %v727_v31  ;;  %1382 = vmatmul.mubr.f32.gmra.mxu1 %v735_v32 }
 0x1c3   : > { %1372 = vmatprep.mubr.f32.mxu0 %v728_v35  ;;  %1384 = vmatprep.mubr.f32.mxu1 %v736_v36 }
 0x1c6   : > { %1373 = vmatmul.mubr.f32.gmra.mxu0 %v729_v39  ;;  %1385 = vmatmul.mubr.f32.gmra.mxu1 %v737_v40 }
 0x27a   : > { %v1365_v42 = vpop.f32.mrf.mxu0  ;;  %v1377_v43 = vpop.f32.mrf.mxu1 }
 0x27b   : > { %v833_v44 = vadd.f32 %v1365_v42, %v2253_v41  ;;  %v873_v45 = vadd.f32 %v1377_v43, %v2253_v41 }
 0x27c   : > { %v827_v47 = vpop.f32.mrf.mxu0  ;;  %v867_v48 = vpop.f32.mrf.mxu1 }
 0x27d   : > { %v907_v49 = vmax.f32 %v833_v44, 0.0  ;;  %v915_v50 = vmax.f32 %v873_v45, 0.0  ;;  %v828_v51 = vadd.f32 %v2253_v41, %v827_v47  ;;  %v868_v52 = vadd.f32 %v2253_v41, %v867_v48 }
 0x27e   : > { %v1368_v54 = vpop.f32.mrf.mxu0  ;;  %v1380_v55 = vpop.f32.mrf.mxu1 }
 0x27f   : > { %v930_v56 = vmul.f32 %v2260_v46, %v907_v49  ;;  %v938_v57 = vmul.f32 %v2260_v46, %v915_v50  ;;  %v906_v58 = vmax.f32 %v828_v51, 0.0  ;;  %v914_v59 = vmax.f32 %v868_v52, 0.0 }
 0x280   : > { %v843_v60 = vadd.f32 %v1368_v54, %v2253_v41  ;;  %v883_v61 = vadd.f32 %v1380_v55, %v2253_v41  ;;  %v837_v62 = vpop.f32.mrf.mxu0  ;;  %v877_v63 = vpop.f32.mrf.mxu1 }
 0x281   : > { %v953_v0 = vadd.f32 %v2267_v53, %v930_v56  ;;  %v961_v1 = vadd.f32 %v2267_v53, %v938_v57  ;;  %v929_v2 = vmul.f32 %v2260_v46, %v906_v58  ;;  %v937_v3 = vmul.f32 %v2260_v46, %v914_v59 }
 0x282   : > { %v909_v4 = vmax.f32 %v843_v60, 0.0  ;;  %v917_v5 = vmax.f32 %v883_v61, 0.0  ;;  %v838_v6 = vadd.f32 %v2253_v41, %v837_v62  ;;  %v878_v7 = vadd.f32 %v2253_v41, %v877_v63  ;;  %v1371_v8 = vpop.f32.mrf.mxu0  ;;  %v1383_v9 = vpop.f32.mrf.mxu1 }
 0x283   : > { %969 = vst [vmem:[%s2206_s21 + $0x8] sm:$0xff] %v953_v0  ;;  %977 = vst [vmem:[%s2206_s21 + $0x48] sm:$0xff] %v961_v1  ;;  %v952_v10 = vadd.f32 %v2267_v53, %v929_v2  ;;  %v960_v11 = vadd.f32 %v2267_v53, %v937_v3  ;;  %v853_v12 = vadd.f32 %v1371_v8, %v2253_v41 }
 0x284   : > { %v893_v13 = vadd.f32 %v1383_v9, %v2253_v41  ;;  %v932_v14 = vmul.f32 %v2260_v46, %v909_v4  ;;  %v940_v15 = vmul.f32 %v2260_v46, %v917_v5  ;;  %v908_v16 = vmax.f32 %v838_v6, 0.0  ;;  %v847_v18 = vpop.f32.mrf.mxu0  ;;  %v887_v19 = vpop.f32.mrf.mxu1 }
 0x285   : > { %v916_v17 = vmax.f32 %v878_v7, 0.0  ;;  %968 = vst [vmem:[%s2206_s21] sm:$0xff] %v952_v10  ;;  %976 = vst [vmem:[%s2206_s21 + $0x40] sm:$0xff] %v960_v11  ;;  %v911_v20 = vmax.f32 %v853_v12, 0.0  ;;  %v848_v22 = vadd.f32 %v2253_v41, %v847_v18  ;;  %v888_v23 = vadd.f32 %v2253_v41, %v887_v19 }
 0x286   : > { %v919_v21 = vmax.f32 %v893_v13, 0.0  ;;  %v955_v24 = vadd.f32 %v2267_v53, %v932_v14  ;;  %v963_v25 = vadd.f32 %v2267_v53, %v940_v15  ;;  %v931_v26 = vmul.f32 %v2260_v46, %v908_v16  ;;  %v1374_v28 = vpop.f32.mrf.mxu0  ;;  %v1386_v29 = vpop.f32.mrf.mxu1 }
 0x287   : > { %v939_v27 = vmul.f32 %v2260_v46, %v916_v17  ;;  %v934_v30 = vmul.f32 %v2260_v46, %v911_v20  ;;  %v910_v32 = vmax.f32 %v848_v22, 0.0  ;;  %v918_v33 = vmax.f32 %v888_v23, 0.0 }
 0x288   : > { %v942_v31 = vmul.f32 %v2260_v46, %v919_v21  ;;  %971 = vst [vmem:[%s2206_s21 + $0x18] sm:$0xff] %v955_v24  ;;  %979 = vst [vmem:[%s2206_s21 + $0x58] sm:$0xff] %v963_v25  ;;  %v954_v34 = vadd.f32 %v2267_v53, %v931_v26  ;;  %v863_v36 = vadd.f32 %v1374_v28, %v2253_v41  ;;  %v857_v38 = vpop.f32.mrf.mxu0  ;;  %v897_v39 = vpop.f32.mrf.mxu1 }
 0x289   : > { %v962_v35 = vadd.f32 %v2267_v53, %v939_v27  ;;  %v903_v37 = vadd.f32 %v1386_v29, %v2253_v41  ;;  %v957_v40 = vadd.f32 %v2267_v53, %v934_v30  ;;  %v933_v43 = vmul.f32 %v2260_v46, %v910_v32 }
 0x28a   : > { %v965_v42 = vadd.f32 %v2267_v53, %v942_v31  ;;  %v941_v44 = vmul.f32 %v2260_v46, %v918_v33  ;;  %970 = vst [vmem:[%s2206_s21 + $0x10] sm:$0xff] %v954_v34  ;;  %v913_v45 = vmax.f32 %v863_v36, 0.0  ;;  %v858_v48 = vadd.f32 %v2253_v41, %v857_v38 }
 0x28b   : > { %978 = vst [vmem:[%s2206_s21 + $0x50] sm:$0xff] %v962_v35  ;;  %v921_v47 = vmax.f32 %v903_v37, 0.0  ;;  %v898_v49 = vadd.f32 %v2253_v41, %v897_v39  ;;  %973 = vst [vmem:[%s2206_s21 + $0x28] sm:$0xff] %v957_v40  ;;  %v956_v50 = vadd.f32 %v2267_v53, %v933_v43 }
 0x28c   : > { %981 = vst [vmem:[%s2206_s21 + $0x68] sm:$0xff] %v965_v42  ;;  %v964_v51 = vadd.f32 %v2267_v53, %v941_v44  ;;  %v936_v52 = vmul.f32 %v2260_v46, %v913_v45  ;;  %v912_v55 = vmax.f32 %v858_v48, 0.0 }
 0x28d   : > { %v944_v54 = vmul.f32 %v2260_v46, %v921_v47  ;;  %v920_v56 = vmax.f32 %v898_v49, 0.0  ;;  %972 = vst [vmem:[%s2206_s21 + $0x20] sm:$0xff] %v956_v50 }
 0x28e   : > { %980 = vst [vmem:[%s2206_s21 + $0x60] sm:$0xff] %v964_v51  ;;  %v959_v57 = vadd.f32 %v2267_v53, %v936_v52  ;;  %v935_v58 = vmul.f32 %v2260_v46, %v912_v55 }
 0x28f   : > { %v967_v41 = vadd.f32 %v2267_v53, %v944_v54  ;;  %v943_v59 = vmul.f32 %v2260_v46, %v920_v56 }
 0x290   : > { %975 = vst [vmem:[%s2206_s21 + $0x38] sm:$0xff] %v959_v57  ;;  %v958_v60 = vadd.f32 %v2267_v53, %v935_v58 }
 0x291   : > { %983 = vst [vmem:[%s2206_s21 + $0x78] sm:$0xff] %v967_v41  ;;  %v966_v61 = vadd.f32 %v2267_v53, %v943_v59 }
 0x292   : > { %974 = vst [vmem:[%s2206_s21 + $0x30] sm:$0xff] %v958_v60 }
 0x293   : > { %982 = vst [vmem:[%s2206_s21 + $0x70] sm:$0xff] %v966_v61 }
 0x294 PF: > { %s2485_s22 = sld [smem:[#allocation19_spill]]  ;;  %s998_s19 = sshll.u32 %s2206_s21, 4  ;;  %s2336_s19 = int_to_ptr.vmem [resolvable:$true] %s998_s19 }
 0x295   : > { %s2486_s16 = sld [smem:[#allocation31_spill]]  ;;  %s2340_s15 = scalar_lea.sflag [#allocation5], %s358_s20 }
 0x296   : > { %s1715_s1 = scalar_lea.vmem %s2336_s19, 2048  ;;  %p2487_p1 = scmp.ne.s32.totalorder %s2470_s27, 0 }
 0x297   : > { %p1716_p0 = scmp.ne.s32.totalorder %s2336_s19, %s1715_s1  ;;  %s1882_s7 = smov [#allocation11]  }
 0x298   : > { %s1719_s29 = sshll.u32 %s1882_s7, 4  ;;  %s1720_s29 = int_to_ptr.vmem [resolvable:$false] %s1719_s29 }
 0x299   : > { %p1717_p9 = pnand %p1716_p0, %p2487_p1  ;;  %s1721_s10 = scalar_lea.vmem %s1720_s29, 4096 }
 0x29a   : > { %s1171_s18 = sshll.u32 %s2485_s22, 11  ;;  %p1722_p8 = scmp.lt.s32.totalorder %s2336_s19, %s1720_s29 }
 0x29b   : > { %s2333_s30 = scalar_lea.hbm %s2486_s16, %s1171_s18  ;;  %p1718_p7 = pneg %p1717_p9 }
 0x29c   : > { %p1723_p10 = scmp.lt.s32.totalorder %s1721_s10, %s1715_s1 }
 0x29e   : > { %p1724_p5 = por %p1723_p10, %p1722_p8 }
 0x2a0   : > { %p1725_p6 = pnand %p1724_p5, %p1718_p7 }
 0x2a2   : > { %1728 = shalt.err (!%p1725_p6)
}
 0x2a3   : > { %s1729_s20 = scalar_lea.hbm %s2333_s30, 2048  ;;  %s1733_s3 = scalar_lea.hbm %s2486_s16, 4096 }
 0x2a4   : > { %p1730_p2 = scmp.ne.s32.totalorder %s2333_s30, %s1729_s20  ;;  %p1734_p13 = scmp.lt.s32.totalorder %s2333_s30, %s2486_s16 }
 0x2a5   : > { %p1735_p3 = scmp.lt.s32.totalorder %s1733_s3, %s1729_s20 }
 0x2a6   : > { %p1731_p12 = pnand %p1730_p2, %p2487_p1 }
 0x2a7   : > { %p1736_p11 = por %p1735_p3, %p1734_p13 }
 0x2a8   : > { %p1732_p4 = pneg %p1731_p12 }
 0x2aa   : > { %p1737_p0 = pnand %p1736_p11, %p1732_p4 }
 0x2ac   : > { %1740 = shalt.err (!%p1737_p0)
}
 0x2ad   : > { %s1883_s22 = smov 128   ;;  %s1884_s18 = smov 8  }
 0x2ae   : > { %1461 = dma.vmem_to_hbm [thread:$0]  (%p2487_p1), %s2336_s19, 2048, %s2333_s30, %s2340_s15, %s1883_s22, %s1883_s22, %s1884_s18  }
 0x2af PF: > { %p1484_p9 = scmp.ge.s32.totalorder %s1871_s14, 2  ;;  %s1013_s11 = sand.u32 1, %s1819_s24  }
 0x2b0   : > { %p2488_p7 = scmp.ne.s32.totalorder %s2472_s23, 0  ;;  %s1014_s4 = scalar_lea.sflag [#allocation5], %s1013_s11 }
 0x2b2   : > { %p1478_p8 = pnand %p1484_p9, %p2488_p7 }
 0x2b4   : > { %p1479_p10 = pneg %p1478_p8 }
 0x2b6   : > { %1814 = dma.done.wait (%p1479_p10), %s1014_s4, 2048  }
 0x2b7   : > { %1816 = vsyncadd (%p1479_p10), %s1014_s4, 4294965248  ;;  %s27_s14 = sadd.s32 1, %s1871_s14   ;;  %s2490_s30 = sld [smem:[#allocation17_spill]] }
 0x2b8   : > { %p2368_p5 = scmp.ge.s32.totalorder %s27_s14, 6   ;;  %s2491_s29 = sld [smem:[#allocation23_spill]] }
 0x2b9   : > { %s2492_s11 = sld [smem:[#allocation20_spill]]  ;;  %s2495_s24 = smov %s1823_s25 }
 0x2ba   : > { %s2493_s23 = sld [smem:[#allocation21_spill]]  ;;  %s2496_s25 = smov %s1827_s26 }
 0x2bb   : > { %s2494_s13 = sld [smem:[#allocation22_spill]]  ;;  %s2497_s26 = smov %s2129_s17 }
 0x2bc   : > { %s2498_s27 = smov %s1835_s28  ;;  %s2503_s10 = smov %s1863_s12 }
 0x2bd   : > { %s2499_s28 = smov %s2490_s30  ;;  %s2500_s30 = smov %s1847_s8 }
 0x2be   : > { %s2501_s8 = smov %s1851_s9  ;;  %s2502_s9 = smov %s2090_s6 }
 0x2bf   :  { %26 = sbr.rel (!%p2368_p5) target bundleno = 21 (0x15), region = 129 }
 0x2c0   : > { %s2504_s12 = smov %s2493_s23 }
 0x2c4   :  { %1019 = vsyncpa [#allocation4], 1 }
 0x2c5   :  { %1021 = vsyncpa [#allocation4 + $0x1], 1 }
 0x2c6   :  { %1022 = vsyncpa [#allocation7], 1 }
 0x2c7   :  { %1024 = vsyncpa [#allocation7 + $0x1], 1 }
 0x2c8   :  { %1025 = vsyncpa [#allocation10], 1 }
 0x2c9   :  { %1026 = vsyncpa [#allocation5], 1 }
 0x2ca   :  { %1028 = vsyncpa [#allocation5 + $0x1], 1 }

</bundles_post_ra>
